<compile_context>
chip_gen: v7x
topology: tpu7x:2x2x1
jax: 0.10.0
libtpu: 0.0.40
codegen_flags: <defaults>
</compile_context>

<pallas_src>
import functools

import jax
import jax.numpy as jnp
from jax.experimental import pallas as pl
from jax.experimental.pallas import tpu as pltpu


# ----------------------------------------------------------------------------
# Kernel
# ----------------------------------------------------------------------------
def record_encoder_kernel(*refs, size, use_int_mxu, has_thr):
    """count[b, d] = sum_k onehot[b, k] * table[k, d]; then majority vote."""
    if has_thr:
        onehot_ref, table_ref, thr_ref, out_ref, acc_ref = refs
    else:
        onehot_ref, table_ref, out_ref, acc_ref = refs
        thr_ref = None

    k = pl.program_id(2)                       # contraction axis is always axis 2

    @pl.when(k == 0)
    def _init():
        acc_ref[...] = jnp.zeros_like(acc_ref)

    if use_int_mxu:
        # v4/v5e/v6e: native int8 MXU path, exact int32 accumulation.
        acc_ref[...] += jnp.dot(onehot_ref[...], table_ref[...],
                                preferred_element_type=jnp.int32)
    else:
        # v7x has no integer MXU: ship int8 over HBM, cast on the VPU, f32 acc.
        acc_ref[...] += jnp.dot(onehot_ref[...].astype(jnp.bfloat16),
                                table_ref[...].astype(jnp.bfloat16),
                                preferred_element_type=jnp.float32)

    @pl.when(k == pl.num_programs(2) - 1)
    def _finalize():
        count = acc_ref[...]
        if thr_ref is None:                    # odd multiset size: scalar threshold
            out_ref[...] = (count > (size // 2)).astype(jnp.int8)
        else:                                  # even: tie-breaker folded into thr[d]
            out_ref[...] = (count > thr_ref[...].astype(count.dtype)).astype(jnp.int8)


# ----------------------------------------------------------------------------
# Tiling / hardware helpers
# ----------------------------------------------------------------------------
def _round_up(v, m):
    return (v + m - 1) // m * m


def _cdiv(a, b):
    return -(-a // b)


def _divisor_tiles(total, unit):
    n = total // unit
    return sorted({unit * d for d in range(1, n + 1) if n % d == 0}, reverse=True)


def _device_kind():
    try:
        return jax.devices()[0].device_kind.lower()
    except Exception:
        return ""


def _mxu_has_int8():
    # v4/v5/v6 MXUs have an integer operand path; v7x is bf16/fp8 only.
    return any(tag in _device_kind() for tag in ("v4", "v5", "v6"))


def _vmem_capacity_bytes():
    try:
        return int(pltpu.get_tpu_info().vmem_capacity_bytes)
    except Exception:
        pass
    kind = _device_kind()
    if "v5" in kind or "v6" in kind:
        return 128 << 20
    return 64 << 20                            # v7x / safe default


def _plan_tiles(batch, K, D, cast_in_kernel, vmem_budget):
    """Pick (batch_tile, tile_k, tile_d) + padded sizes under a VMEM budget."""
    Dp = _round_up(D, 256)                     # lane-dense; 256 = MXU N on v6e/v7x
    d_cands = [t for t in _divisor_tiles(Dp, 256) if t <= 4096] or [256]

    K1 = _round_up(K, 128)                     # sublane packing for int8/bf16 operands
    n_k = _cdiv(K1, 1024)
    tile_k = _round_up(_cdiv(K1, n_k), 128)

    b1 = _round_up(batch, 32)                  # int8 sublane packing along M
    n_b = _cdiv(b1, 512)                       # M ~512 keeps v6e MXU-bound
    batch_tile = _round_up(_cdiv(b1, n_b), 32)

    def need(bt, tk, td):
        n = 2 * (bt * tk + tk * td)            # double-buffered int8 operands
        n += 2 * td * 4                        # threshold vector (double-buffered)
        n += 2 * bt * td                       # int8 output (double-buffered)
        n += bt * td * 4                       # f32/int32 accumulator scratch
        if cast_in_kernel:
            n += (bt * tk + tk * td) * 2       # bf16 operand copies for the MXU (v7x)
        return n

    if n_k == 1 and n_b == 1 and need(batch_tile, tile_k, Dp) <= vmem_budget:
        tile_d = Dp                            # tiny problem: single grid step
    else:
        cands = [t for t in d_cands if Dp // t >= 2] or d_cands   # >=2 D tiles
        while True:
            tile_d = next((t for t in cands
                           if need(batch_tile, tile_k, t) <= vmem_budget), None)
            if tile_d is not None:
                break
            if batch_tile > 32:
                batch_tile = _round_up(max(32, batch_tile // 2), 32)
            elif tile_k > 128:
                tile_k = _round_up(max(128, tile_k // 2), 128)
            else:
                tile_d = cands[-1]             # smallest tile; vmem_limit raised below
                break

    bp = _round_up(batch, batch_tile)
    Kp = _round_up(K, tile_k)
    return batch_tile, tile_k, tile_d, bp, Kp, Dp, need(batch_tile, tile_k, tile_d)


# ----------------------------------------------------------------------------
# Wrapper
# ----------------------------------------------------------------------------
def record_encoder(x, position, level_hv, tiebreaker, *, low, high):
    batch, size = x.shape
    levels, D = level_hv.shape
    assert position.shape == (size, D)
    K = size * levels

    use_int_mxu = _mxu_has_int8()
    cap = _vmem_capacity_bytes()
    budget = cap // 2                          # headroom for Mosaic internals
    bt, tk, td, bp, Kp, Dp, need_b = _plan_tiles(
        batch, K, D, cast_in_kernel=not use_int_mxu, vmem_budget=budget)
    vmem_limit = int(min(cap * 3 // 4, max(32 << 20, need_b + (8 << 20))))

    # --- D-invariant preprocessing hoisted out of the kernel grid -----------
    # ScatterCode value embedding: quantize x in [low, high] to a level index.
    # TODO(synk): jnp.round is round-half-to-even; torchhd may bucketize exact
    # level midpoints differently.
    norm = (x.astype(jnp.float32) - low) / (high - low)
    idx = jnp.clip(jnp.round(norm * (levels - 1)), 0, levels - 1).astype(jnp.int32)
    onehot = jax.nn.one_hot(idx, levels, dtype=jnp.int8).reshape(batch, K)
    onehot = jnp.pad(onehot, ((0, bp - batch), (0, Kp - K)))

    # Bind folded into a table: T[s*levels + l] = position[s] XOR level_hv[l].
    table = jnp.bitwise_xor(position.astype(jnp.uint8)[:, None, :],
                            level_hv.astype(jnp.uint8)[None, :, :]).reshape(K, D)
    table = jnp.pad(table, ((0, Kp - K), (0, Dp - D))).astype(jnp.int8)

    # Majority threshold; torchhd's even-size tie-breaker HV folded in:
    #   count + tie > (size+1)//2   <=>   count > (size+1)//2 - tie.
    has_thr = (size % 2 == 0)
    operands = [onehot, table]
    if has_thr:
        thr = (size + 1) // 2 - tiebreaker.reshape(1, D).astype(jnp.int32)
        operands.append(jnp.pad(thr, ((0, 0), (0, Dp - D))))

    n_b, n_d, n_k = bp // bt, Dp // td, Kp // tk

    # Grid-axis order: make the operand with the larger refetch traffic resident
    # across the inner axis; contraction (k) is innermost in either case.
    t_batch_inner = Kp * Dp * (1 if n_k == 1 else n_b) + bp * Kp * n_d
    t_d_inner = bp * Kp * (1 if n_k == 1 else n_d) + Kp * Dp * n_b
    if t_batch_inner <= t_d_inner:             # typical HDC case: D >> batch
        grid = (n_d, n_b, n_k)
        oh_map, tb_map = (lambda j, i, k: (i, k)), (lambda j, i, k: (k, j))
        th_map, out_map = (lambda j, i, k: (0, j)), (lambda j, i, k: (i, j))
    else:
        grid = (n_b, n_d, n_k)
        oh_map, tb_map = (lambda i, j, k: (i, k)), (lambda i, j, k: (k, j))
        th_map, out_map = (lambda i, j, k: (0, j)), (lambda i, j, k: (i, j))

    in_specs = [pl.BlockSpec((bt, tk), oh_map),            # one-hot (int8)
                pl.BlockSpec((tk, td), tb_map)]            # XOR table (int8)
    if has_thr:
        in_specs.append(pl.BlockSpec((1, td), th_map))     # per-column threshold

    kern = functools.partial(record_encoder_kernel, size=size,
                             use_int_mxu=use_int_mxu, has_thr=has_thr)
    acc_dtype = jnp.int32 if use_int_mxu else jnp.float32

    out = pl.pallas_call(
        kern,
        out_shape=jax.ShapeDtypeStruct((bp, Dp), jnp.int8),
        grid_spec=pltpu.PrefetchScalarGridSpec(
            num_scalar_prefetch=0,
            grid=grid,
            in_specs=in_specs,
            out_specs=pl.BlockSpec((bt, td), out_map),
            scratch_shapes=[pltpu.VMEM((bt, td), acc_dtype)]),
        compiler_params=pltpu.CompilerParams(
            dimension_semantics=("parallel", "parallel", "arbitrary"),
            vmem_limit_bytes=vmem_limit),
    )(*operands)

    # Values are {0,1}; int8 -> uint8 is a cheap byte-wise pass (torch uint8 parity).
    return out[:batch, :D].astype(jnp.uint8)


# ----------------------------------------------------------------------------
# Deterministic synthetic parameters mirroring RecordEncoder.__init__
# ----------------------------------------------------------------------------
def make_params(key, size, out_features, levels):
    k_pos, k_base, k_flip, k_tie = jax.random.split(key, 4)
    # embeddings.Random(size, out_features, vsa='BSC', dtype=uint8)
    position = jax.random.bernoulli(k_pos, 0.5, (size, out_features)).astype(jnp.uint8)
    # ScatterCode(levels, out_features, low, high) codebook:
    # TODO(synk): exact ScatterCode codebook construction approximated with
    # cumulative random bit flips between consecutive levels (rate 1/levels).
    base = jax.random.bernoulli(k_base, 0.5, (out_features,)).astype(jnp.uint8)
    flips = jax.random.bernoulli(
        k_flip, 1.0 / levels, (levels - 1, out_features)).astype(jnp.uint8)
    lvls = [base]
    for i in range(levels - 1):
        lvls.append(jnp.bitwise_xor(lvls[-1], flips[i]))
    level_hv = jnp.stack(lvls, axis=0)
    # fixed tie-breaker HV (torchhd draws this at bundle time from an RNG)
    tiebreaker = jax.random.bernoulli(k_tie, 0.5, (1, out_features)).astype(jnp.uint8)
    return position, level_hv, tiebreaker


if __name__ == "__main__":
    out_features, size, levels = 512, 16, 8
    low, high = 0.0, 1.0
    batch = 2

    key = jax.random.PRNGKey(0)
    k_param, k_x = jax.random.split(key)
    position, level_hv, tiebreaker = make_params(k_param, size, out_features, levels)
    x = jax.random.uniform(k_x, (batch, size), jnp.float32, minval=low, maxval=high)

    out = record_encoder(x, position, level_hv, tiebreaker, low=low, high=high)
    jax.block_until_ready(out)

    assert out.shape == (batch, out_features), out.shape
    assert out.dtype == jnp.uint8, out.dtype
    assert bool(jnp.all((out == 0) | (out == 1)))

    # Pure-JAX reference of the same math (select -> XOR bind -> majority).
    norm = (x - low) / (high - low)
    idx = jnp.clip(jnp.round(norm * (levels - 1)), 0, levels - 1).astype(jnp.int32)
    val_hv = level_hv[idx]                                   # (B, S, D)
    bound = jnp.bitwise_xor(val_hv, position[None, :, :])    # (B, S, D)
    count = jnp.sum(bound.astype(jnp.int32), axis=1)         # (B, D)
    if size % 2 == 0:
        count = count + tiebreaker.astype(jnp.int32)
        ref = (count > ((size + 1) // 2)).astype(jnp.uint8)
    else:
        ref = (count > (size // 2)).astype(jnp.uint8)
    assert bool(jnp.all(out == ref))

    print("KERNEL_OK")
</pallas_src>

<mosaic_0001>
module attributes {stable_mosaic.version = 11 : i64} {
  func.func @record_encoder_kernel(%arg0: i32, %arg1: i32, %arg2: i32, %arg3: memref<32x128xi8, #tpu.memory_space<vmem>>, %arg4: memref<128x512xi8, #tpu.memory_space<vmem>>, %arg5: memref<1x512xi32, #tpu.memory_space<vmem>>, %arg6: memref<32x512xi8, #tpu.memory_space<vmem>>, %arg7: memref<32x512xf32, #tpu.memory_space<vmem>>) attributes {dimension_semantics = [#tpu.dimension_semantics<parallel>, #tpu.dimension_semantics<parallel>, #tpu.dimension_semantics<arbitrary>], iteration_bounds = array<i64: 1, 1, 1>, scalar_prefetch = 0 : i64, scratch_operands = 1 : i64, tpu.core_type = #tpu.core_type<tc>, window_params = [{transform_indices = @transform_0, window_bounds = array<i64: 32, 128>}, {transform_indices = @transform_1, window_bounds = array<i64: 128, 512>}, {transform_indices = @transform_2, window_bounds = array<i64: 1, 512>}, {transform_indices = @transform_3, window_bounds = array<i64: 32, 512>}]} {
    %c0_i32 = arith.constant 0 : i32
    %0 = arith.cmpi eq, %arg2, %c0_i32 : i32
    %1 = arith.extui %0 : i1 to i32
    %c0_i32_0 = arith.constant 0 : i32
    %2 = arith.cmpi ne, %1, %c0_i32_0 : i32
    scf.if %2 {
      %cst_10 = arith.constant 0.000000e+00 : f32
      %14 = vector.broadcast %cst_10 : f32 to vector<32x512xf32>
      %c0_11 = arith.constant 0 : index
      %c0_12 = arith.constant 0 : index
      %15 = vector.load %arg7[%c0_11, %c0_12] : memref<32x512xf32, #tpu.memory_space<vmem>>, vector<32x512xf32>
      tpu.vector_store %arg7[%c0_11, %c0_12], %14 {strides = array<i32>} : memref<32x512xf32, #tpu.memory_space<vmem>>, vector<32x512xf32>,
    } else {
    }
    %c0 = arith.constant 0 : index
    %c0_1 = arith.constant 0 : index
    %3 = vector.load %arg7[%c0, %c0_1] : memref<32x512xf32, #tpu.memory_space<vmem>>, vector<32x512xf32>
    %c0_2 = arith.constant 0 : index
    %c0_3 = arith.constant 0 : index
    %4 = vector.load %arg3[%c0_2, %c0_3] : memref<32x128xi8, #tpu.memory_space<vmem>>, vector<32x128xi8>
    %5 = arith.sitofp %4 : vector<32x128xi8> to vector<32x128xbf16>
    %c0_4 = arith.constant 0 : index
    %c0_5 = arith.constant 0 : index
    %6 = vector.load %arg4[%c0_4, %c0_5] : memref<128x512xi8, #tpu.memory_space<vmem>>, vector<128x512xi8>
    %7 = arith.sitofp %6 : vector<128x512xi8> to vector<128x512xbf16>
    %cst = arith.constant dense<0.000000e+00> : vector<32x512xf32>
    %8 = tpu.matmul %5, %7, %cst {dimension_numbers = #tpu.dot_dimension_numbers<[1], [0], [0], [1], [0, 0, 1, 1], [], []>} : vector<32x128xbf16>, vector<128x512xbf16>, vector<32x512xf32> -> vector<32x512xf32>
    %9 = arith.addf %3, %8 : vector<32x512xf32>
    %c0_6 = arith.constant 0 : index
    %c0_7 = arith.constant 0 : index
    %10 = vector.load %arg7[%c0_6, %c0_7] : memref<32x512xf32, #tpu.memory_space<vmem>>, vector<32x512xf32>
    tpu.vector_store %arg7[%c0_6, %c0_7], %9 {strides = array<i32>} : memref<32x512xf32, #tpu.memory_space<vmem>>, vector<32x512xf32>,
    %c0_i32_8 = arith.constant 0 : i32
    %11 = arith.cmpi eq, %arg2, %c0_i32_8 : i32
    %12 = arith.extui %11 : i1 to i32
    %c0_i32_9 = arith.constant 0 : i32
    %13 = arith.cmpi ne, %12, %c0_i32_9 : i32
    scf.if %13 {
      %c0_10 = arith.constant 0 : index
      %c0_11 = arith.constant 0 : index
      %14 = vector.load %arg7[%c0_10, %c0_11] : memref<32x512xf32, #tpu.memory_space<vmem>>, vector<32x512xf32>
      %c0_12 = arith.constant 0 : index
      %c0_13 = arith.constant 0 : index
      %15 = vector.load %arg5[%c0_12, %c0_13] : memref<1x512xi32, #tpu.memory_space<vmem>>, vector<1x512xi32>
      %16 = arith.sitofp %15 : vector<1x512xi32> to vector<1x512xf32>
      %17 = vector.broadcast %16 : vector<1x512xf32> to vector<32x512xf32>
      %18 = arith.cmpf ogt, %14, %17 : vector<32x512xf32>
      %19 = arith.extui %18 : vector<32x512xi1> to vector<32x512xi8>
      %c0_14 = arith.constant 0 : index
      %c0_15 = arith.constant 0 : index
      %20 = vector.load %arg6[%c0_14, %c0_15] : memref<32x512xi8, #tpu.memory_space<vmem>>, vector<32x512xi8>
      tpu.vector_store %arg6[%c0_14, %c0_15], %19 {strides = array<i32>} : memref<32x512xi8, #tpu.memory_space<vmem>>, vector<32x512xi8>,
    } else {
    }
    return
  }
  func.func @transform_0(%arg0: i32, %arg1: i32, %arg2: i32) -> (i32, i32) {
    %c0_i32 = arith.constant 0 : i32
    return %arg1, %arg2 : i32, i32
  }
  func.func @transform_1(%arg0: i32, %arg1: i32, %arg2: i32) -> (i32, i32) {
    %c0_i32 = arith.constant 0 : i32
    return %arg2, %arg0 : i32, i32
  }
  func.func @transform_2(%arg0: i32, %arg1: i32, %arg2: i32) -> (i32, i32) {
    %c0_i32 = arith.constant 0 : i32
    %c0_i32_0 = arith.constant 0 : i32
    return %c0_i32, %arg0 : i32, i32
  }
  func.func @transform_3(%arg0: i32, %arg1: i32, %arg2: i32) -> (i32, i32) {
    %c0_i32 = arith.constant 0 : i32
    return %arg1, %arg0 : i32, i32
  }
}

</mosaic_0001>

<bundles_post_ra>
// kernel: tpu_custom_call.1
= control target key start
LH: loop header
LB: loop body
LE: loop exit
PB: predicated region body
PF: predicated region fallthrough
CT: control target
= control target key end

     0   :  { %8 = vsyncpa [#allocation4], 0  ;;  %s545_s0 = inlined_call_operand.hbm [shape: s8[32,128], index: 0, kind: input, shape index: {}]   ;;  %s546_s1 = inlined_call_operand.hbm [shape: s8[128,512], index: 1, kind: input, shape index: {}]   ;;  %s547_s2 = inlined_call_operand.vmem [shape: s32[1,512], index: 2, kind: input, shape index: {}]   ;;  %s548_s3 = inlined_call_operand.hbm [shape: s8[32,512], index: 3, kind: output, shape index: {}]  }
   0x1   :  { %9 = vsyncpa [#allocation7], 0 }
   0x2   :  { %10 = vsyncpa [#allocation5], 0  ;;  %s441_s12 = smov [#allocation3]   ;;  %s442_s14 = smov [#allocation6]  }
   0x3   :  { %s17_s13 = sshll.u32 %s441_s12, 4  ;;  %s26_s15 = sshll.u32 %s442_s14, 4  ;;  %s18_s13 = int_to_ptr.vmem [resolvable:$true] %s17_s13  ;;  %s467_s15 = int_to_ptr.vmem [resolvable:$true] %s26_s15 }
   0x4   :  { %s369_s18 = scalar_lea.hbm %s545_s0, 128 }
   0x5   :  { %p370_p0 = scmp.ne.s32.totalorder %s545_s0, %s369_s18  ;;  %p373_p1 = scmp.lt.u32.totalorder %s369_s18, %s545_s0 }
   0x7   :  { %p375_p2 = pnand %p373_p1, %p370_p0 }
   0x9   :  { %378 = shalt.err (!%p375_p2)
}
   0xa   :  { %s379_s23 = scalar_lea.vmem %s18_s13, 128  ;;  %p384_p4 = scmp.lt.s32.totalorder %s18_s13, %s18_s13 }
   0xb   :  { %p380_p3 = scmp.ne.s32.totalorder %s18_s13, %s379_s23  ;;  %p385_p5 = scmp.lt.s32.totalorder %s379_s23, %s379_s23 }
   0xd   :  { %p386_p6 = por %p385_p5, %p384_p4 }
   0xf   :  { %p387_p7 = pnand %p386_p6, %p380_p3 }
  0x11   :  { %390 = shalt.err (!%p387_p7)
}
  0x12   :  { %20 = dma.hbm_to_vmem [thread:$0]  %s545_s0, 128, %s18_s13, [#allocation4]  }
  0x13   :  { %s391_s28 = scalar_lea.hbm %s546_s1, 2048 }
  0x14   :  { %p392_p8 = scmp.ne.s32.totalorder %s546_s1, %s391_s28  ;;  %p395_p9 = scmp.lt.u32.totalorder %s391_s28, %s546_s1 }
  0x16   :  { %p397_p10 = pnand %p395_p9, %p392_p8 }
  0x18   :  { %400 = shalt.err (!%p397_p10)
}
  0x19   :  { %s401_s6 = scalar_lea.vmem %s467_s15, 2048  ;;  %p406_p12 = scmp.lt.s32.totalorder %s467_s15, %s467_s15 }
  0x1a   :  { %p402_p11 = scmp.ne.s32.totalorder %s467_s15, %s401_s6  ;;  %p407_p13 = scmp.lt.s32.totalorder %s401_s6, %s401_s6 }
  0x1c   :  { %p408_p0 = por %p407_p13, %p406_p12 }
  0x1e   :  { %p409_p1 = pnand %p408_p0, %p402_p11 }
  0x20   :  { %412 = shalt.err (!%p409_p1)
}
  0x21   :  { %s443_s0 = smov 512   ;;  %s444_s7 = smov 32  }
  0x22   :  { %32 = dma.hbm_to_vmem [thread:$0]  %s546_s1, 2048, %s467_s15, [#allocation7], %s443_s0, %s443_s0, %s444_s7  }
  0x23   :  { %435 = dma.done.wait [#allocation4], 128  }
  0x24   :  { %436 = vsyncadd [#allocation4], 4294967168 }
  0x25   :  { %437 = dma.done.wait [#allocation7], 2048  }
  0x26   :  { %438 = vsyncadd [#allocation7], 4294965248  ;;  %v445_v0 = vmov 0   ;;  %v84_v1 = vld [vmem:[#allocation6 + $0x8] sm:$0xff]  ;;  %v86_v2 = vld [vmem:[#allocation6 + $0x18] sm:$0xff]  ;;  %v291_v52 = vlaneseq }
  0x27   :  { %163 = vmatprep.mubr.bf16.mxu0 %v445_v0  ;;  %216 = vmatprep.mubr.bf16.mxu1 %v445_v0  ;;  %v83_v3 = vld [vmem:[#allocation6] sm:$0xff]  ;;  %v100_v4 = vunpack.c.l.s8.bf16 %v84_v1  ;;  %v104_v5 = vunpack.c.h.s8.bf16 %v84_v1  ;;  %v102_v6 = vunpack.c.l.s8.bf16 %v86_v2  ;;  %v106_v7 = vunpack.c.h.s8.bf16 %v86_v2  ;;  %v85_v8 = vld [vmem:[#allocation6 + $0x10] sm:$0xff]  ;;  %v88_v11 = vld [vmem:[#allocation6 + $0x28] sm:$0xff] }
  0x28   :  { %v99_v9 = vunpack.c.l.s8.bf16 %v83_v3  ;;  %v101_v10 = vunpack.c.l.s8.bf16 %v85_v8  ;;  %v90_v12 = vld [vmem:[#allocation6 + $0x38] sm:$0xff]  ;;  %v103_v13 = vunpack.c.h.s8.bf16 %v83_v3  ;;  %v105_v14 = vunpack.c.h.s8.bf16 %v85_v8  ;;  %v87_v17 = vld [vmem:[#allocation6 + $0x20] sm:$0xff]  ;;  %v89_v18 = vld [vmem:[#allocation6 + $0x30] sm:$0xff] }
  0x29   :  { %131 = vmatprep.subr.bf16.mxu0 %v100_v4  ;;  %184 = vmatprep.subr.bf16.mxu1 %v102_v6  ;;  %v108_v15 = vunpack.c.l.s8.bf16 %v88_v11  ;;  %v110_v16 = vunpack.c.l.s8.bf16 %v90_v12  ;;  %v107_v19 = vunpack.c.l.s8.bf16 %v87_v17  ;;  %v109_v20 = vunpack.c.l.s8.bf16 %v89_v18  ;;  %v92_v23 = vld [vmem:[#allocation6 + $0x48] sm:$0xff]  ;;  %v94_v24 = vld [vmem:[#allocation6 + $0x58] sm:$0xff]  ;;  %v91_v29 = vld [vmem:[#allocation6 + $0x40] sm:$0xff] }
  0x2a   :  { %132 = vmatpush1.bf16.msra.mxu0 %v99_v9  ;;  %185 = vmatpush1.bf16.msra.mxu1 %v101_v10  ;;  %v112_v21 = vunpack.c.h.s8.bf16 %v88_v11  ;;  %v114_v22 = vunpack.c.h.s8.bf16 %v90_v12  ;;  %v111_v25 = vunpack.c.h.s8.bf16 %v87_v17  ;;  %v113_v26 = vunpack.c.h.s8.bf16 %v89_v18  ;;  %v93_v30 = vld [vmem:[#allocation6 + $0x50] sm:$0xff]  ;;  %v96_v35 = vld [vmem:[#allocation6 + $0x68] sm:$0xff]  ;;  %v98_v36 = vld [vmem:[#allocation6 + $0x78] sm:$0xff] }
  0x2b   :  { %133 = vmatprep.subr.bf16.mxu0 %v104_v5  ;;  %186 = vmatprep.subr.bf16.mxu1 %v106_v7  ;;  %v116_v27 = vunpack.c.l.s8.bf16 %v92_v23  ;;  %v118_v28 = vunpack.c.l.s8.bf16 %v94_v24  ;;  %v115_v31 = vunpack.c.l.s8.bf16 %v91_v29  ;;  %v117_v32 = vunpack.c.l.s8.bf16 %v93_v30  ;;  %v95_v41 = vld [vmem:[#allocation6 + $0x60] sm:$0xff]  ;;  %v97_v42 = vld [vmem:[#allocation6 + $0x70] sm:$0xff]  ;;  %v80_v49 = vld [vmem:[#allocation3] sm:$0xff] }
  0x2c   :  { %v120_v33 = vunpack.c.h.s8.bf16 %v92_v23  ;;  %v122_v34 = vunpack.c.h.s8.bf16 %v94_v24  ;;  %v119_v37 = vunpack.c.h.s8.bf16 %v91_v29  ;;  %v121_v38 = vunpack.c.h.s8.bf16 %v93_v30  ;;  %v288_v54 = vld [vmem:[%s547_s2] sm:$0xf]  ;;  %s446_s2 = smov [#allocation8]  }
  0x2d   :  { %v124_v39 = vunpack.c.l.s8.bf16 %v96_v35  ;;  %v126_v40 = vunpack.c.l.s8.bf16 %v98_v36  ;;  %v123_v43 = vunpack.c.l.s8.bf16 %v95_v41  ;;  %v125_v44 = vunpack.c.l.s8.bf16 %v97_v42  ;;  %s353_s11 = sshll.u32 %s446_s2, 4  ;;  %s354_s11 = int_to_ptr.vmem [resolvable:$true] %s353_s11 }
  0x2e   :  { %134 = vmatpush1.bf16.msra.mxu0 %v103_v13  ;;  %187 = vmatpush1.bf16.msra.mxu1 %v105_v14  ;;  %v128_v45 = vunpack.c.h.s8.bf16 %v96_v35  ;;  %v130_v46 = vunpack.c.h.s8.bf16 %v98_v36  ;;  %v127_v47 = vunpack.c.h.s8.bf16 %v95_v41  ;;  %v129_v48 = vunpack.c.h.s8.bf16 %v97_v42  ;;  %s413_s12 = scalar_lea.vmem %s354_s11, 512  ;;  %p418_p3 = scmp.lt.s32.totalorder %s354_s11, %s354_s11 }
  0x2f   :  { %135 = vmatprep.subr.bf16.mxu0 %v108_v15  ;;  %188 = vmatprep.subr.bf16.mxu1 %v110_v16  ;;  %v81_v50 = vunpack.c.l.s8.bf16 %v80_v49  ;;  %v82_v51 = vunpack.c.h.s8.bf16 %v80_v49  ;;  %v292_v53 = vshrl.u32 %v291_v52, 7  ;;  %v289_v55 = vcvt.s32.f32 %v288_v54  ;;  %p414_p2 = scmp.ne.s32.totalorder %s354_s11, %s413_s12  ;;  %p419_p4 = scmp.lt.s32.totalorder %s413_s12, %s413_s12 }
  0x31   :  { %v293_v56 = vsub.s32 0, %v292_v53  ;;  %v301_v57 = vsub.s32 2, %v292_v53  ;;  %v297_v58 = vsub.s32 1, %v292_v53  ;;  %v305_v59 = vsub.s32 3, %v292_v53  ;;  %p420_p5 = por %p419_p4, %p418_p3 }
  0x32   :  { %136 = vmatpush1.bf16.msra.mxu0 %v107_v19  ;;  %189 = vmatpush1.bf16.msra.mxu1 %v109_v20 }
  0x33   :  { %137 = vmatprep.subr.bf16.mxu0 %v112_v21  ;;  %190 = vmatprep.subr.bf16.mxu1 %v114_v22  ;;  %v294_v60 = vrot.slane %v289_v55, %v293_v56  ;;  %v302_v63 = vrot.slane %v289_v55, %v301_v57  ;;  %v298_v2 = vrot.slane %v289_v55, %v297_v58  ;;  %p421_p6 = pnand %p420_p5, %p414_p2 }
  0x34   :  { %v306_v4 = vrot.slane %v289_v55, %v305_v59 }
  0x36   :  { %138 = vmatpush1.bf16.msra.mxu0 %v111_v25  ;;  %191 = vmatpush1.bf16.msra.mxu1 %v113_v26 }
  0x37   :  { %139 = vmatprep.subr.bf16.mxu0 %v116_v27  ;;  %192 = vmatprep.subr.bf16.mxu1 %v118_v28 }
  0x3a   :  { %140 = vmatpush1.bf16.msra.mxu0 %v115_v31  ;;  %193 = vmatpush1.bf16.msra.mxu1 %v117_v32 }
  0x3b   :  { %141 = vmatprep.subr.bf16.mxu0 %v120_v33  ;;  %194 = vmatprep.subr.bf16.mxu1 %v122_v34 }
  0x3e   :  { %142 = vmatpush1.bf16.msra.mxu0 %v119_v37  ;;  %195 = vmatpush1.bf16.msra.mxu1 %v121_v38 }
  0x3f   :  { %143 = vmatprep.subr.bf16.mxu0 %v124_v39  ;;  %196 = vmatprep.subr.bf16.mxu1 %v126_v40 }
  0x42   :  { %144 = vmatpush1.bf16.msra.mxu0 %v123_v43  ;;  %197 = vmatpush1.bf16.msra.mxu1 %v125_v44 }
  0x43   :  { %145 = vmatprep.subr.bf16.mxu0 %v128_v45  ;;  %198 = vmatprep.subr.bf16.mxu1 %v130_v46 }
  0x46   :  { %146 = vmatpush1.bf16.msra.mxu0 %v127_v47  ;;  %199 = vmatpush1.bf16.msra.mxu1 %v129_v48 }
  0x49   :  { %164 = vmatmul.mubr.bf16.vlgmr.msra.gmra.mrb[0].mxu0 %v81_v50  ;;  %217 = vmatmul.mubr.bf16.vlgmr.msra.gmra.mrb[0].mxu1 %v81_v50 }
  0x4a   :  { %173 = vmatprep.mubr.bf16.mxu0 %v445_v0  ;;  %226 = vmatprep.mubr.bf16.mxu1 %v445_v0 }
  0x51   :  { %174 = vmatmul.mubr.bf16.gmra.mrb[4].mxu0 %v82_v51  ;;  %227 = vmatmul.mubr.bf16.gmra.mrb[4].mxu1 %v82_v51 }
 0x11c   :  { %v165_v61 = vpop.f32.mrb[0].mxu0  ;;  %v218_v62 = vpop.f32.mrb[0].mxu1 }
 0x11d   :  { %v167_v1 = vpop.f32.mrb[1].mxu0  ;;  %v220_v3 = vpop.f32.mrb[1].mxu1  ;;  %vm311_vm0 = vcmp.gt.f32.partialorder %v165_v61, %v294_v60  ;;  %vm313_vm3 = vcmp.gt.f32.partialorder %v218_v62, %v302_v63 }
 0x11e   :  { %v169_v5 = vpop.f32.mrb[2].mxu0  ;;  %v222_v6 = vpop.f32.mrb[2].mxu1  ;;  %vm312_vm7 = vcmp.gt.f32.partialorder %v167_v1, %v298_v2  ;;  %vm314_vm9 = vcmp.gt.f32.partialorder %v220_v3, %v306_v4 }
 0x11f   :  { %vm315_vm1 = vcmp.gt.f32.partialorder %v169_v5, %v294_v60  ;;  %vm317_vm2 = vcmp.gt.f32.partialorder %v222_v6, %v302_v63  ;;  %v171_v7 = vpop.f32.mrb[3].mxu0  ;;  %v224_v8 = vpop.f32.mrb[3].mxu1 }
 0x120   :  { %vm505_vm4 = vmpackc.low %vm315_vm1, %vm311_vm0  ;;  %vm316_vm5 = vcmp.gt.f32.partialorder %v171_v7, %v298_v2  ;;  %vm318_vm6 = vcmp.gt.f32.partialorder %v224_v8, %v306_v4 }
 0x121   :  { %vm509_vm8 = vmpackc.low %vm317_vm2, %vm313_vm3 }
 0x122   :  { %vm513_vm10 = vmpackc.low %vm316_vm5, %vm312_vm7 }
 0x123   :  { %vm517_vm11 = vmpackc.low %vm318_vm6, %vm314_vm9 }
 0x124   :  { %v175_v13 = vpop.f32.mrb[4].mxu0  ;;  %v228_v14 = vpop.f32.mrb[4].mxu1 }
 0x125   :  { %v177_v15 = vpop.f32.mrb[5].mxu0  ;;  %v230_v16 = vpop.f32.mrb[5].mxu1  ;;  %vm319_vm12 = vcmp.gt.f32.partialorder %v175_v13, %v294_v60  ;;  %vm321_vm0 = vcmp.gt.f32.partialorder %v228_v14, %v302_v63 }
 0x126   :  { %v179_v17 = vpop.f32.mrb[6].mxu0  ;;  %v232_v18 = vpop.f32.mrb[6].mxu1  ;;  %vm320_vm5 = vcmp.gt.f32.partialorder %v177_v15, %v298_v2 }
 0x127   :  { %vm323_vm13 = vcmp.gt.f32.partialorder %v179_v17, %v294_v60  ;;  %vm325_vm14 = vcmp.gt.f32.partialorder %v232_v18, %v302_v63  ;;  %v181_v19 = vpop.f32.mrb[7].mxu0  ;;  %v234_v20 = vpop.f32.mrb[7].mxu1 }
 0x128   :  { %vm328_vm15 = vmpackc.low %vm323_vm13, %vm319_vm12  ;;  %vm324_vm2 = vcmp.gt.f32.partialorder %v181_v19, %v298_v2  ;;  %vm326_vm7 = vcmp.gt.f32.partialorder %v234_v20, %v306_v4  ;;  %vm322_vm12 = vcmp.gt.f32.partialorder %v230_v16, %v306_v4 }
 0x129   :  { %vm329_vm1 = vmpackc.even %vm328_vm15, %vm505_vm4 }
 0x12a   :  { %v339_v21 = vsel %vm329_vm1, 16843009, %v445_v0  ;;  %vm334_vm3 = vmpackc.low %vm325_vm14, %vm321_vm0 }
 0x12b   :  { %343 = vst [vmem:[#allocation8] sm:$0xff] %v339_v21  ;;  %vm335_vm6 = vmpackc.even %vm334_vm3, %vm509_vm8 }
 0x12c   :  { %v341_v22 = vsel %vm335_vm6, 16843009, %v445_v0  ;;  %vm331_vm9 = vmpackc.low %vm324_vm2, %vm320_vm5 }
 0x12d   :  { %345 = vst [vmem:[#allocation8 + $0x10] sm:$0xff] %v341_v22  ;;  %vm332_vm4 = vmpackc.even %vm331_vm9, %vm513_vm10 }
 0x12e   :  { %v340_v23 = vsel %vm332_vm4, 16843009, %v445_v0  ;;  %vm337_vm13 = vmpackc.low %vm326_vm7, %vm322_vm12 }
 0x12f   :  { %344 = vst [vmem:[#allocation8 + $0x8] sm:$0xff] %v340_v23  ;;  %vm338_vm14 = vmpackc.even %vm337_vm13, %vm517_vm11 }
 0x130   :  { %v342_v24 = vsel %vm338_vm14, 16843009, %v445_v0 }
 0x131   :  { %346 = vst [vmem:[#allocation8 + $0x18] sm:$0xff] %v342_v24 }
 0x132   :  { %424 = shalt.err (!%p421_p6)
}
 0x133   :  { %s425_s15 = scalar_lea.hbm %s548_s3, 512 }
 0x134   :  { %p426_p7 = scmp.ne.s32.totalorder %s548_s3, %s425_s15  ;;  %p429_p8 = scmp.lt.u32.totalorder %s425_s15, %s548_s3 }
 0x136   :  { %p431_p9 = pnand %p429_p8, %p426_p7 }
 0x138   :  { %434 = shalt.err (!%p431_p9)
}
 0x139   :  { %356 = dma.vmem_to_hbm [thread:$0]  %s354_s11, 512, %s548_s3, [#allocation5]  }
 0x13a   :  { %439 = dma.done.wait [#allocation5], 512  }
 0x13b   :  { %440 = vsyncadd [#allocation5], 4294966784 }
 0x13c   :  { %360 = vsyncpa [#allocation4], 1 }
 0x13d   :  { %361 = vsyncpa [#allocation7], 1 }
 0x13e   :  { %362 = vsyncpa [#allocation5], 1 }

</bundles_post_ra>
